<compile_context>
chip_gen: v7x
topology: tpu7x:2x2x1
jax: 0.10.0
libtpu: 0.0.40
codegen_flags: <defaults>
</compile_context>

<pallas_src>
import functools
import math

import jax
import jax.numpy as jnp
from jax.experimental import pallas as pl
from jax.experimental.pallas import tpu as pltpu

LANE = 128        # every internal feature dim is padded to a multiple of this
ROW_ALIGN = 16    # bf16 packs 16 rows per sublane group


def _pad_up(n, m):
    return ((n + m - 1) // m) * m


# ---------------------------------------------------------------------------
# Fused MLP kernel.  refs = (x_ref, w0, b0, w1, b1, ..., wL, bL, o_ref)
# All layers are chained in-register / in-VMEM; only the final tile is stored.
# ---------------------------------------------------------------------------
def _mlp_kernel(*refs, num_layers, neg_slope):
    x_ref = refs[0]
    o_ref = refs[-1]
    wb_refs = refs[1:-1]

    # Input arrives as f32 at its natural width; cast on the VPU (cheaper than
    # a wrapper-side padded bf16 copy, which costs an extra HBM round trip).
    h = x_ref[...].astype(jnp.bfloat16)                   # [TB, in_nodes]
    for l in range(num_layers):
        w = wb_refs[2 * l][...]                           # [K(_pad), N_pad] bf16
        b = wb_refs[2 * l + 1][...]                       # [1, N_pad]       f32
        y = jnp.dot(h, w, preferred_element_type=jnp.float32) + b
        if l < num_layers - 1:                            # hidden layer
            yb = y.astype(w.dtype)                        # bf16 activation
            h = jnp.maximum(yb, neg_slope * yb)           # LeakyReLU (1 select)
        else:
            h = y                                         # final layer, f32 accum
    o_ref[...] = h.astype(o_ref.dtype)


# ---------------------------------------------------------------------------
# Parameter construction (mirrors nn.Linear init, incl. the PyTorch quirk).
# Layer 0 keeps its natural K (x is passed unpadded); all output dims and the
# K dims of later layers are zero-padded to 128 multiples (lane-dense, inert).
# ---------------------------------------------------------------------------
def init_generator_params(key, in_nodes, hidden_nodes, out_nodes,
                          w_dtype=jnp.bfloat16):
    # PyTorch quirk: every hidden Linear is Linear(in_nodes, h_dim); forward is
    # only shape-valid if all hidden widths except the last equal in_nodes.
    assert all(h == in_nodes for h in hidden_nodes[:-1]), (
        "PyTorch module quirk: hidden_nodes[:-1] must all equal in_nodes")

    layer_dims = [(in_nodes, h) for h in hidden_nodes]
    layer_dims.append((hidden_nodes[-1], out_nodes))      # final Linear

    params = []
    for l, (fan_in, fan_out) in enumerate(layer_dims):
        key, kw, kb = jax.random.split(key, 3)
        bound = 1.0 / math.sqrt(fan_in)
        w = jax.random.uniform(kw, (fan_in, fan_out), jnp.float32, -bound, bound)
        b = jax.random.uniform(kb, (fan_out,), jnp.float32, -bound, bound)
        kp = fan_in if l == 0 else _pad_up(fan_in, LANE)   # layer 0: unpadded K
        np_ = _pad_up(fan_out, LANE)
        wp = jnp.zeros((kp, np_), w_dtype).at[:fan_in, :fan_out].set(
            w.astype(w_dtype))
        bp = jnp.zeros((1, np_), jnp.float32).at[0, :fan_out].set(b)
        params.append((wp, bp))
    return params


# ---------------------------------------------------------------------------
# Wrapper: one fused pallas_call over a batch grid (>= 4 steps when possible).
# ---------------------------------------------------------------------------
def generator_forward(params, x, out_nodes, *, batch_tile=512, neg_slope=0.01,
                      out_dtype=jnp.bfloat16):
    B, in_nodes = x.shape
    assert params[0][0].shape[0] == in_nodes
    Op = params[-1][0].shape[1]         # padded output feature dim
    num_layers = len(params)

    # Tile: 16-row aligned (bf16 packing), as big as possible up to batch_tile,
    # but leave >= 4 grid steps (2 per TensorCore on v7x) so DMAs stay hidden.
    tb = max(ROW_ALIGN, min(batch_tile, _pad_up(pl.cdiv(B, 4), ROW_ALIGN)))
    Bp = _pad_up(B, tb)

    # Only materialize a padded copy when the batch itself needs padding; the
    # feature dim is passed at natural width (block dim == full array dim).
    xp = x if Bp == B else jnp.zeros((Bp, in_nodes), x.dtype).at[:B].set(x)

    flat = []
    for w, b in params:
        flat += [w, b]

    wb_bytes = sum(int(a.size) * a.dtype.itemsize for a in flat)   # single-buffered
    tile_bytes = 2 * (tb * in_nodes * x.dtype.itemsize             # dbl-buffered x
                      + tb * Op * jnp.dtype(out_dtype).itemsize)   # dbl-buffered out
    vmem_bytes = wb_bytes + tile_bytes + (8 << 20)                 # + headroom

    try:
        vmem_cap = pltpu.get_tpu_info().vmem_capacity_bytes
    except Exception:
        vmem_cap = 64 << 20   # v7x (smallest generation) as conservative default
    if vmem_bytes > int(0.75 * vmem_cap):
        # TODO(synk): K/N-tile the weights over an extra "arbitrary" grid axis with
        # a VMEM f32 accumulator (pl.when init/finalize) when they exceed VMEM.
        raise NotImplementedError(
            f"resident weights ({wb_bytes / 2**20:.1f} MiB) exceed the fused-path "
            f"VMEM budget ({vmem_cap / 2**20:.0f} MiB); tiled path not implemented")

    kernel = functools.partial(_mlp_kernel, num_layers=num_layers,
                               neg_slope=neg_slope)

    # Weights/biases: full-array blocks, constant index_map -> stay resident;
    # single-buffered since their block index never changes across grid steps.
    wb_specs = []
    for w, b in params:
        wb_specs.append(pl.BlockSpec(w.shape, lambda i: (0, 0),
                                     pipeline_mode=pl.Buffered(1)))
        wb_specs.append(pl.BlockSpec(b.shape, lambda i: (0, 0),
                                     pipeline_mode=pl.Buffered(1)))

    flops = 2 * Bp * sum(int(w.shape[0]) * int(w.shape[1]) for w, _ in params)
    bytes_accessed = (Bp * in_nodes * x.dtype.itemsize + wb_bytes
                      + Bp * Op * jnp.dtype(out_dtype).itemsize)
    cost = pl.CostEstimate(flops=flops, transcendentals=0,
                           bytes_accessed=bytes_accessed)

    out_padded = pl.pallas_call(
        kernel,
        out_shape=jax.ShapeDtypeStruct((Bp, Op), out_dtype),
        grid=(Bp // tb,),
        in_specs=[pl.BlockSpec((tb, in_nodes), lambda i: (i, 0))] + wb_specs,
        out_specs=pl.BlockSpec((tb, Op), lambda i: (i, 0)),
        compiler_params=pltpu.CompilerParams(
            dimension_semantics=("parallel",),
            vmem_limit_bytes=int(min(max(vmem_bytes, 32 << 20), vmem_cap))),
        cost_estimate=cost,
    )(xp, *flat)

    return out_padded[:B, :out_nodes]


# ---------------------------------------------------------------------------
# Pure-JAX reference following the exact same (bf16 matmul, f32 accum) recipe.
# ---------------------------------------------------------------------------
def generator_forward_ref(params, x, out_nodes, neg_slope=0.01,
                          out_dtype=jnp.bfloat16):
    h = x.astype(jnp.bfloat16)
    n = len(params)
    for l, (w, b) in enumerate(params):
        y = jnp.dot(h, w, preferred_element_type=jnp.float32) + b
        if l < n - 1:
            yb = y.astype(w.dtype)
            h = jnp.maximum(yb, neg_slope * yb)
        else:
            h = y
    return h.astype(out_dtype)[:, :out_nodes]


if __name__ == "__main__":
    in_nodes = 32
    hidden_nodes = (32, 64)   # all but the last must equal in_nodes (module quirk)
    out_nodes = 16
    batch = 256               # tb=64 -> grid of 4 (>= 2 steps per v7x core)

    key = jax.random.PRNGKey(0)
    key, kx = jax.random.split(key)
    x = jax.random.normal(kx, (batch, in_nodes), jnp.float32)

    params = init_generator_params(key, in_nodes, hidden_nodes, out_nodes)

    y = generator_forward(params, x, out_nodes)
    y = jax.block_until_ready(y)

    y_ref = generator_forward_ref(params, x, out_nodes)
    assert y.shape == (batch, out_nodes)
    # Output is bf16 (halved writeback); tolerance covers ~2 bf16 ulps of the
    # final rounding on top of bf16-matmul/f32-accum drift.
    yf, rf = y.astype(jnp.float32), y_ref.astype(jnp.float32)
    assert jnp.allclose(yf, rf, atol=1e-2, rtol=1e-2), \
        float(jnp.max(jnp.abs(yf - rf)))

    print("KERNEL_OK")
</pallas_src>

<mosaic_0001>
module attributes {stable_mosaic.version = 11 : i64} {
  func.func @_mlp_kernel(%arg0: i32, %arg1: memref<64x32xf32, #tpu.memory_space<vmem>>, %arg2: memref<32x128xbf16, #tpu.memory_space<vmem>>, %arg3: memref<1x128xf32, #tpu.memory_space<vmem>>, %arg4: memref<128x128xbf16, #tpu.memory_space<vmem>>, %arg5: memref<1x128xf32, #tpu.memory_space<vmem>>, %arg6: memref<128x128xbf16, #tpu.memory_space<vmem>>, %arg7: memref<1x128xf32, #tpu.memory_space<vmem>>, %arg8: memref<64x128xbf16, #tpu.memory_space<vmem>>) attributes {dimension_semantics = [#tpu.dimension_semantics<parallel>], iteration_bounds = array<i64: 4>, scalar_prefetch = 0 : i64, scratch_operands = 0 : i64, tpu.core_type = #tpu.core_type<tc>, window_params = [{transform_indices = @transform_0, window_bounds = array<i64: 64, 32>}, {pipeline_mode = #tpu.pipeline_mode<synchronous>, transform_indices = @transform_1, window_bounds = array<i64: 32, 128>}, {pipeline_mode = #tpu.pipeline_mode<synchronous>, transform_indices = @transform_2, window_bounds = array<i64: 1, 128>}, {pipeline_mode = #tpu.pipeline_mode<synchronous>, transform_indices = @transform_3, window_bounds = array<i64: 128, 128>}, {pipeline_mode = #tpu.pipeline_mode<synchronous>, transform_indices = @transform_4, window_bounds = array<i64: 1, 128>}, {pipeline_mode = #tpu.pipeline_mode<synchronous>, transform_indices = @transform_5, window_bounds = array<i64: 128, 128>}, {pipeline_mode = #tpu.pipeline_mode<synchronous>, transform_indices = @transform_6, window_bounds = array<i64: 1, 128>}, {transform_indices = @transform_7, window_bounds = array<i64: 64, 128>}]} {
    %c0 = arith.constant 0 : index
    %c0_0 = arith.constant 0 : index
    %0 = vector.load %arg1[%c0, %c0_0] : memref<64x32xf32, #tpu.memory_space<vmem>>, vector<64x32xf32>
    %1 = arith.truncf %0 : vector<64x32xf32> to vector<64x32xbf16>
    %c0_1 = arith.constant 0 : index
    %c0_2 = arith.constant 0 : index
    %2 = vector.load %arg2[%c0_1, %c0_2] : memref<32x128xbf16, #tpu.memory_space<vmem>>, vector<32x128xbf16>
    %c0_3 = arith.constant 0 : index
    %c0_4 = arith.constant 0 : index
    %3 = vector.load %arg3[%c0_3, %c0_4] : memref<1x128xf32, #tpu.memory_space<vmem>>, vector<1x128xf32>
    %cst = arith.constant dense<0.000000e+00> : vector<64x128xf32>
    %4 = tpu.matmul %1, %2, %cst {dimension_numbers = #tpu.dot_dimension_numbers<[1], [0], [0], [1], [0, 0, 1, 1], [], []>} : vector<64x32xbf16>, vector<32x128xbf16>, vector<64x128xf32> -> vector<64x128xf32>
    %5 = vector.broadcast %3 : vector<1x128xf32> to vector<64x128xf32>
    %6 = arith.addf %4, %5 : vector<64x128xf32>
    %7 = arith.truncf %6 : vector<64x128xf32> to vector<64x128xbf16>
    %cst_5 = arith.constant 1.000980e-02 : bf16
    %8 = vector.broadcast %cst_5 : bf16 to vector<64x128xbf16>
    %9 = arith.mulf %8, %7 : vector<64x128xbf16>
    %10 = arith.maximumf %7, %9 : vector<64x128xbf16>
    %c0_6 = arith.constant 0 : index
    %c0_7 = arith.constant 0 : index
    %11 = vector.load %arg4[%c0_6, %c0_7] : memref<128x128xbf16, #tpu.memory_space<vmem>>, vector<128x128xbf16>
    %c0_8 = arith.constant 0 : index
    %c0_9 = arith.constant 0 : index
    %12 = vector.load %arg5[%c0_8, %c0_9] : memref<1x128xf32, #tpu.memory_space<vmem>>, vector<1x128xf32>
    %cst_10 = arith.constant dense<0.000000e+00> : vector<64x128xf32>
    %13 = tpu.matmul %10, %11, %cst_10 {dimension_numbers = #tpu.dot_dimension_numbers<[1], [0], [0], [1], [0, 0, 1, 1], [], []>} : vector<64x128xbf16>, vector<128x128xbf16>, vector<64x128xf32> -> vector<64x128xf32>
    %14 = vector.broadcast %12 : vector<1x128xf32> to vector<64x128xf32>
    %15 = arith.addf %13, %14 : vector<64x128xf32>
    %16 = arith.truncf %15 : vector<64x128xf32> to vector<64x128xbf16>
    %cst_11 = arith.constant 1.000980e-02 : bf16
    %17 = vector.broadcast %cst_11 : bf16 to vector<64x128xbf16>
    %18 = arith.mulf %17, %16 : vector<64x128xbf16>
    %19 = arith.maximumf %16, %18 : vector<64x128xbf16>
    %c0_12 = arith.constant 0 : index
    %c0_13 = arith.constant 0 : index
    %20 = vector.load %arg6[%c0_12, %c0_13] : memref<128x128xbf16, #tpu.memory_space<vmem>>, vector<128x128xbf16>
    %c0_14 = arith.constant 0 : index
    %c0_15 = arith.constant 0 : index
    %21 = vector.load %arg7[%c0_14, %c0_15] : memref<1x128xf32, #tpu.memory_space<vmem>>, vector<1x128xf32>
    %cst_16 = arith.constant dense<0.000000e+00> : vector<64x128xf32>
    %22 = tpu.matmul %19, %20, %cst_16 {dimension_numbers = #tpu.dot_dimension_numbers<[1], [0], [0], [1], [0, 0, 1, 1], [], []>} : vector<64x128xbf16>, vector<128x128xbf16>, vector<64x128xf32> -> vector<64x128xf32>
    %23 = vector.broadcast %21 : vector<1x128xf32> to vector<64x128xf32>
    %24 = arith.addf %22, %23 : vector<64x128xf32>
    %25 = arith.truncf %24 : vector<64x128xf32> to vector<64x128xbf16>
    %c0_17 = arith.constant 0 : index
    %c0_18 = arith.constant 0 : index
    %26 = vector.load %arg8[%c0_17, %c0_18] : memref<64x128xbf16, #tpu.memory_space<vmem>>, vector<64x128xbf16>
    tpu.vector_store %arg8[%c0_17, %c0_18], %25 {strides = array<i32>} : memref<64x128xbf16, #tpu.memory_space<vmem>>, vector<64x128xbf16>,
    return
  }
  func.func @transform_0(%arg0: i32) -> (i32, i32) {
    %c0_i32 = arith.constant 0 : i32
    %c0_i32_0 = arith.constant 0 : i32
    return %arg0, %c0_i32 : i32, i32
  }
  func.func @transform_1(%arg0: i32) -> (i32, i32) {
    %c0_i32 = arith.constant 0 : i32
    %c0_i32_0 = arith.constant 0 : i32
    %c0_i32_1 = arith.constant 0 : i32
    return %c0_i32, %c0_i32_0 : i32, i32
  }
  func.func @transform_2(%arg0: i32) -> (i32, i32) {
    %c0_i32 = arith.constant 0 : i32
    %c0_i32_0 = arith.constant 0 : i32
    %c0_i32_1 = arith.constant 0 : i32
    return %c0_i32, %c0_i32_0 : i32, i32
  }
  func.func @transform_3(%arg0: i32) -> (i32, i32) {
    %c0_i32 = arith.constant 0 : i32
    %c0_i32_0 = arith.constant 0 : i32
    %c0_i32_1 = arith.constant 0 : i32
    return %c0_i32, %c0_i32_0 : i32, i32
  }
  func.func @transform_4(%arg0: i32) -> (i32, i32) {
    %c0_i32 = arith.constant 0 : i32
    %c0_i32_0 = arith.constant 0 : i32
    %c0_i32_1 = arith.constant 0 : i32
    return %c0_i32, %c0_i32_0 : i32, i32
  }
  func.func @transform_5(%arg0: i32) -> (i32, i32) {
    %c0_i32 = arith.constant 0 : i32
    %c0_i32_0 = arith.constant 0 : i32
    %c0_i32_1 = arith.constant 0 : i32
    return %c0_i32, %c0_i32_0 : i32, i32
  }
  func.func @transform_6(%arg0: i32) -> (i32, i32) {
    %c0_i32 = arith.constant 0 : i32
    %c0_i32_0 = arith.constant 0 : i32
    %c0_i32_1 = arith.constant 0 : i32
    return %c0_i32, %c0_i32_0 : i32, i32
  }
  func.func @transform_7(%arg0: i32) -> (i32, i32) {
    %c0_i32 = arith.constant 0 : i32
    %c0_i32_0 = arith.constant 0 : i32
    return %arg0, %c0_i32 : i32, i32
  }
}

</mosaic_0001>

<bundles_post_ra>
// kernel: tpu_custom_call.1
= control target key start
LH: loop header
LB: loop body
LE: loop exit
PB: predicated region body
PF: predicated region fallthrough
CT: control target
= control target key end

     0   :  { %12 = vsyncpa [#allocation3], 0  ;;  %s1313_s0 = inlined_call_operand.vmem [shape: f32[256,32], index: 0, kind: input, shape index: {}]   ;;  %s1314_s1 = inlined_call_operand.vmem [shape: bf16[32,128], index: 1, kind: input, shape index: {}]   ;;  %s1315_s2 = inlined_call_operand.vmem [shape: f32[1,128], index: 2, kind: input, shape index: {}]   ;;  %s1316_s3 = inlined_call_operand.vmem [shape: bf16[128,128], index: 3, kind: input, shape index: {}]   ;;  %s1317_s4 = inlined_call_operand.vmem [shape: f32[1,128], index: 4, kind: input, shape index: {}]   ;;  %s1318_s5 = inlined_call_operand.vmem [shape: bf16[128,128], index: 5, kind: input, shape index: {}]   ;;  %s1319_s6 = inlined_call_operand.vmem [shape: f32[1,128], index: 6, kind: input, shape index: {}]   ;;  %s1320_s7 = inlined_call_operand.hbm [shape: bf16[256,128], index: 7, kind: output, shape index: {}]  }
   0x1   :  { %14 = vsyncpa [#allocation3 + $0x1], 0  ;;  %s1140_s24 = smov 0   ;;  %s1142_s25 = smov 0  }
   0x2   :  { %s1144_s26 = smov 0   ;;  %s1146_s27 = smov 0  }
   0x3 LB: > { %s1161_s28 = sadd.s32 4294967295, %s1095_s27   ;;  %s807_s29 = sadd.s32 4294967294, %s1095_s27   ;;  %s1095_s27 = sphi %s1146_s27, %s1326_s27   ;;  %s1091_s26 = sphi %s1144_s26, %s1325_s26   ;;  %s1087_s25 = sphi %s1142_s25, %s1324_s25   ;;  %s1083_s24 = sphi %s1140_s24, %s1323_s24  }
   0x4   : > { %s1165_s30 = sadd.s32 1, %s1095_s27   ;;  %s179_s8 = sadd.s32 1, %s1091_s26 }
   0x5   : > { %s176_s9 = ssub.s32 %s1095_s27, %s1165_s30  ;;  %p189_p0 = scmp.ne.s32.totalorder %s1091_s26, %s1087_s25 }
   0x6   : > { %p177_p1 = scmp.eq.s32.totalorder %s176_s9, 0  ;;  %p190_p2 = scmp.eq.s32.totalorder %s1161_s28, 3 }
   0x7   : > { %p195_p3 = scmp.ne.s32.totalorder %s1087_s25, %s1083_s24  ;;  %p196_p4 = scmp.eq.s32.totalorder %s807_s29, 3 }
   0x8   : > { %s1176_s10 = scalar_select %p177_p1, %s1091_s26, %s179_s8  }
   0x9   : > { %p1178_p5 = por %p190_p2, %p189_p0  ;;  %p1182_p6 = por %p196_p4, %p195_p3 }
   0xa   : > { %p810_p7 = scmp.ge.s32.totalorder %s1095_s27, 1  ;;  %p241_p8 = scmp.lt.s32.totalorder %s1095_s27, 5 }
   0xc   : > { %p242_p9 = pnand %p810_p7, %p241_p8 }
   0xd   : > { %v1015_v0 = vld [vmem:[%s1314_s1] sm:$0xff] (!%p242_p9)   ;;  %s812_s15 = sshll.u32 (!%p242_p9), %s1161_s28, 3  ;;  %v1016_v1 = vld [vmem:[%s1314_s1 + $0x8] sm:$0xff] (!%p242_p9)   ;;  %v1019_v4 = vld [vmem:[%s1316_s3 + $0x10] sm:$0xff] (!%p242_p9)   ;;  %vm317_vm0 = vcmask (!%p242_p9), 261120   ;;  %s270_s16 = sand.u32 (!%p242_p9), 1, %s1087_s25  }
   0xe   : > { %245 = sbr.rel (%p242_p9) target bundleno = 718 (0x2ce), region = 48  ;;  %p274_p10 = scmp.lt.s32.totalorder (!%p242_p9), %s812_s15, 31  ;;  %914 = vmatprep.subr.bf16.mxu0 (!%p242_p9), %v1015_v0  ;;  %v1017_v2 = vld [vmem:[%s1316_s3] sm:$0xff] (!%p242_p9)   ;;  %v1018_v3 = vld [vmem:[%s1316_s3 + $0x8] sm:$0xff] (!%p242_p9)   ;;  %v1020_v14 = vld [vmem:[%s1316_s3 + $0x18] sm:$0xff] (!%p242_p9)  }
   0xf   : > { %915 = vmatpush3.bf16.msra.mxu0 (!%p242_p9), %v1015_v0  ;;  %926 = vmatprep.subr.bf16.mxu1 (!%p242_p9), %v1017_v2  ;;  %v1021_v17 = vld [vmem:[%s1316_s3 + $0x20] sm:$0xff] (!%p242_p9)   ;;  %v1022_v19 = vld [vmem:[%s1316_s3 + $0x28] sm:$0xff] (!%p242_p9)   ;;  %v1023_v20 = vld [vmem:[%s1316_s3 + $0x30] sm:$0xff] (!%p242_p9)   ;;  %s811_s19 = sshll.u32 (!%p242_p9), %s270_s16, 5  ;;  %s1097_s13 = smov (!%p242_p9), [#allocation2]  }
  0x10   : > { %916 = vmatprep.subr.bf16.mxu0 (!%p242_p9), %v1016_v1  ;;  %927 = vmatpush3.bf16.msra.mxu1 (!%p242_p9), %v1017_v2  ;;  %v1024_v21 = vld [vmem:[%s1316_s3 + $0x38] sm:$0xff] (!%p242_p9)   ;;  %v1025_v22 = vld [vmem:[%s1318_s5] sm:$0xff] (!%p242_p9)   ;;  %v1026_v23 = vld [vmem:[%s1318_s5 + $0x8] sm:$0xff] (!%p242_p9)   ;;  %s272_s20 = scalar_lea.vmem (!%p242_p9), [#allocation2], %s811_s19  ;;  %s1037_s14 = sshll.u32 (!%p242_p9), %s1097_s13, 4  ;;  %s1038_s14 = int_to_ptr.vmem [resolvable:$false] %s1037_s14 }
  0x11   : > { %928 = vmatprep.subr.bf16.mxu1 (!%p242_p9), %v1018_v3  ;;  %v1027_v24 = vld [vmem:[%s1318_s5 + $0x10] sm:$0xff] (!%p242_p9)   ;;  %v1028_v25 = vld [vmem:[%s1318_s5 + $0x18] sm:$0xff] (!%p242_p9)   ;;  %v1029_v26 = vld [vmem:[%s1318_s5 + $0x20] sm:$0xff] (!%p242_p9)   ;;  %s745_s21 = sshll.u32 (!%p242_p9), %s272_s20, 4  ;;  %s1263_s21 = int_to_ptr.vmem [resolvable:$true] %s745_s21 }
  0x12   : > { %v814_v28 = vld [vmem:[%s1315_s2] ss:$0 sm:$0xff] (!%p242_p9)  ;;  %v1030_v56 = vld [vmem:[%s1318_s5 + $0x28] sm:$0xff] (!%p242_p9)   ;;  %v1031_v57 = vld [vmem:[%s1318_s5 + $0x30] sm:$0xff] (!%p242_p9)   ;;  %s1033_s9 = scalar_lea.vmem (!%p242_p9), %s1263_s21, 512  ;;  %p1040_p0 = scmp.lt.s32.totalorder (!%p242_p9), %s1263_s21, %s1038_s14 }
  0x13   : > { %917 = vmatpush3.bf16.msra.mxu0 (!%p242_p9), %v1016_v1  ;;  %v1032_v58 = vld [vmem:[%s1318_s5 + $0x38] sm:$0xff] (!%p242_p9)   ;;  %v821_v60 = vld [vmem:[%s1317_s4] ss:$0 sm:$0xff] (!%p242_p9)  ;;  %p1034_p11 = scmp.ne.s32.totalorder (!%p242_p9), %s1263_s21, %s1033_s9 }
  0x14   : > { %929 = vmatpush3.bf16.msra.mxu1 (!%p242_p9), %v1018_v3  ;;  %950 = vmatprep.subr.bf16.mxu0 (!%p242_p9), %v1025_v22 }
  0x15   : > { %s1328_s15 = smov (!%p274_p10, %s812_s15), 31  ;;  %930 = vmatprep.subr.bf16.mxu1 %v1019_v4  ;;  %p1035_p12 = pnand %p1034_p11, %p1178_p5 }
  0x16   : > { %s813_s22 = sshll.u32 %s1328_s15, 3  ;;  %s1039_s15 = scalar_lea.vmem %s1038_s14, 1024 }
  0x17   : > { %s277_s8 = scalar_lea.vmem %s1313_s0, %s813_s22  ;;  %s860_s22 = sshll.u32 %s1161_s28, 9 }
  0x18   : > { %v282_v5 = vld [vmem:[%s277_s8] sm:$0xff]  ;;  %v283_v6 = vld [vmem:[%s277_s8 + $0x8] sm:$0xff]  ;;  %v284_v7 = vld [vmem:[%s277_s8 + $0x10] sm:$0xff]  ;;  %931 = vmatpush3.bf16.msra.mxu1 %v1019_v4  ;;  %s1272_s28 = scalar_lea.sflag [#allocation3], %s270_s16  ;;  %p1036_p13 = pneg %p1035_p12 }
  0x19   : > { %v290_v8 = vpack.c.bf16 %v283_v6, %v282_v5  ;;  %v285_v9 = vld [vmem:[%s277_s8 + $0x18] sm:$0xff]  ;;  %v286_v10 = vld [vmem:[%s277_s8 + $0x20] sm:$0xff]  ;;  %v287_v11 = vld [vmem:[%s277_s8 + $0x28] sm:$0xff]  ;;  %932 = vmatprep.subr.bf16.mxu1 %v1020_v14  ;;  %p1041_p1 = scmp.lt.s32.totalorder %s1039_s15, %s1033_s9 }
  0x1a   : > { %v291_v12 = vpack.c.bf16 %v285_v9, %v284_v7  ;;  %v292_v13 = vpack.c.bf16 %v287_v11, %v286_v10  ;;  %v288_v15 = vld [vmem:[%s277_s8 + $0x30] sm:$0xff]  ;;  %v289_v16 = vld [vmem:[%s277_s8 + $0x38] sm:$0xff]  ;;  %s1268_s8 = scalar_lea.hbm %s1320_s7, %s860_s22 }
  0x1b   : > { %918 = vmatprep.mubr.msk.bf16.mxu0 %vm317_vm0, %v290_v8  ;;  %v293_v18 = vpack.c.bf16 %v289_v16, %v288_v15  ;;  %p1042_p2 = por %p1041_p1, %p1040_p0 }
  0x1c   : > { %919 = vmatmul.mubr.msk.bf16.vlgmr.msra.gmra.mrb[0].mxu0 %vm317_vm0, %v291_v12  ;;  %933 = vmatpush3.bf16.msra.mxu1 %v1020_v14 }
  0x1d   : > { %922 = vmatprep.mubr.msk.bf16.mxu0 %vm317_vm0, %v292_v13  ;;  %934 = vmatprep.subr.bf16.mxu1 %v1021_v17  ;;  %p1043_p3 = pnand %p1042_p2, %p1036_p13 }
  0x1e   : > { %951 = vmatpush3.bf16.msra.mxu0 %v1025_v22 }
  0x1f   : > { %952 = vmatprep.subr.bf16.mxu0 %v1026_v23 }
  0x20   : > { %935 = vmatpush3.bf16.msra.mxu1 %v1021_v17 }
  0x21   : > { %936 = vmatprep.subr.bf16.mxu1 %v1022_v19 }
  0x22   : > { %953 = vmatpush3.bf16.msra.mxu0 %v1026_v23 }
  0x23   : > { %954 = vmatprep.subr.bf16.mxu0 %v1027_v24 }
  0x24   : > { %923 = vmatmul.mubr.msk.bf16.gmra.mrb[4].mxu0 %vm317_vm0, %v293_v18  ;;  %937 = vmatpush3.bf16.msra.mxu1 %v1022_v19 }
  0x25   : > { %938 = vmatprep.subr.bf16.mxu1 %v1023_v20 }
  0x26   : > { %955 = vmatpush3.bf16.msra.mxu0 %v1027_v24 }
  0x27   : > { %956 = vmatprep.subr.bf16.mxu0 %v1028_v25 }
  0x28   : > { %939 = vmatpush3.bf16.msra.mxu1 %v1023_v20 }
  0x29   : > { %940 = vmatprep.subr.bf16.mxu1 %v1024_v21 }
  0x2a   : > { %957 = vmatpush3.bf16.msra.mxu0 %v1028_v25  ;;  %v830_v25 = vld [vmem:[%s1319_s6] ss:$0 sm:$0xff] }
  0x2b   : > { %958 = vmatprep.subr.bf16.mxu0 %v1029_v26 }
  0x2c   : > { %941 = vmatpush3.bf16.msra.mxu1 %v1024_v21 }
  0x2e   : > { %959 = vmatpush3.bf16.msra.mxu0 %v1029_v26 }
  0x2f   : > { %960 = vmatprep.subr.bf16.mxu0 %v1030_v56 }
  0x32   : > { %961 = vmatpush3.bf16.msra.mxu0 %v1030_v56 }
  0x33   : > { %962 = vmatprep.subr.bf16.mxu0 %v1031_v57 }
  0x36   : > { %963 = vmatpush3.bf16.msra.mxu0 %v1031_v57 }
  0x37   : > { %964 = vmatprep.subr.bf16.mxu0 %v1032_v58 }
  0x3a   : > { %965 = vmatpush3.bf16.msra.mxu0 %v1032_v58 }
  0xef   : > { %v920_v27 = vpop.f32.mrb[0].mxu0 }
  0xf0   : > { %v364_v29 = vpop.f32.mrb[1].mxu0  ;;  %v373_v31 = vadd.f32 %v920_v27, %v814_v28 }
  0xf1   : > { %v921_v30 = vpop.f32.mrb[2].mxu0  ;;  %v365_v34 = vadd.f32 %v814_v28, %v364_v29 }
  0xf2   : > { %v376_v32 = vadd.f32 %v921_v30, %v814_v28  ;;  %v367_v33 = vpop.f32.mrb[3].mxu0 }
  0xf3   : > { %v368_v35 = vadd.f32 %v814_v28, %v367_v33 }
  0xf4   : > { %v396_v36 = vpack.c.bf16 %v376_v32, %v373_v31 }
  0xf5   : > { %v395_v37 = vpack.c.bf16 %v368_v35, %v365_v34 }
  0xf6   : > { %v400_v38 = vmul.bf16 1009007652, %v396_v36 }
  0xf7   : > { %v924_v39 = vpop.f32.mrb[4].mxu0  ;;  %v399_v40 = vmul.bf16 1009007652, %v395_v37 }
  0xf8   : > { %v380_v41 = vpop.f32.mrb[5].mxu0  ;;  %v389_v44 = vadd.f32 %v924_v39, %v814_v28  ;;  %v404_v47 = vmax.bf16 %v400_v38, %v396_v36 }
  0xf9   : > { %v925_v42 = vpop.f32.mrb[6].mxu0  ;;  %v403_v43 = vmax.bf16 %v399_v40, %v395_v37  ;;  %v381_v48 = vadd.f32 %v814_v28, %v380_v41 }
  0xfa   : > { %v392_v45 = vadd.f32 %v925_v42, %v814_v28  ;;  %v383_v46 = vpop.f32.mrb[7].mxu0 }
  0xfb   : > { %v384_v49 = vadd.f32 %v814_v28, %v383_v46  ;;  %942 = vmatprep.mubr.bf16.mxu1 %v403_v43 }
  0xfc   : > { %v398_v50 = vpack.c.bf16 %v392_v45, %v389_v44  ;;  %943 = vmatmul.mubr.bf16.vlgmr.msra.gmra.mrb[0].mxu1 %v404_v47 }
  0xfd   : > { %v397_v51 = vpack.c.bf16 %v384_v49, %v381_v48 }
  0xfe   : > { %v402_v52 = vmul.bf16 1009007652, %v398_v50 }
  0xff   : > { %v401_v53 = vmul.bf16 1009007652, %v397_v51 }
 0x100   : > { %v406_v55 = vmax.bf16 %v402_v52, %v398_v50 }
 0x101   : > { %v405_v54 = vmax.bf16 %v401_v53, %v397_v51 }
 0x103   : > { %946 = vmatprep.mubr.bf16.mxu1 %v405_v54 }
 0x104   : > { %947 = vmatmul.mubr.bf16.gmra.mrb[4].mxu1 %v406_v55 }
 0x1cf   : > { %v944_v59 = vpop.f32.mrb[0].mxu1 }
 0x1d0   : > { %v512_v61 = vpop.f32.mrb[1].mxu1  ;;  %v521_v63 = vadd.f32 %v944_v59, %v821_v60 }
 0x1d1   : > { %v945_v62 = vpop.f32.mrb[2].mxu1  ;;  %v513_v2 = vadd.f32 %v821_v60, %v512_v61 }
 0x1d2   : > { %v524_v0 = vadd.f32 %v945_v62, %v821_v60  ;;  %v515_v1 = vpop.f32.mrb[3].mxu1 }
 0x1d3   : > { %v516_v3 = vadd.f32 %v821_v60, %v515_v1 }
 0x1d4   : > { %v544_v4 = vpack.c.bf16 %v524_v0, %v521_v63 }
 0x1d5   : > { %v543_v5 = vpack.c.bf16 %v516_v3, %v513_v2 }
 0x1d6   : > { %v548_v6 = vmul.bf16 1009007652, %v544_v4 }
 0x1d7   : > { %v547_v7 = vmul.bf16 1009007652, %v543_v5  ;;  %v948_v8 = vpop.f32.mrb[4].mxu1 }
 0x1d8   : > { %v528_v9 = vpop.f32.mrb[5].mxu1  ;;  %v552_v12 = vmax.bf16 %v548_v6, %v544_v4  ;;  %v537_v13 = vadd.f32 %v948_v8, %v821_v60 }
 0x1d9   : > { %v949_v10 = vpop.f32.mrb[6].mxu1  ;;  %v551_v11 = vmax.bf16 %v547_v7, %v543_v5  ;;  %v529_v16 = vadd.f32 %v821_v60, %v528_v9 }
 0x1da   : > { %v540_v14 = vadd.f32 %v949_v10, %v821_v60  ;;  %v531_v15 = vpop.f32.mrb[7].mxu1 }
 0x1db   : > { %v532_v17 = vadd.f32 %v821_v60, %v531_v15  ;;  %966 = vmatprep.mubr.bf16.mxu0 %v551_v11 }
 0x1dc   : > { %v546_v18 = vpack.c.bf16 %v540_v14, %v537_v13  ;;  %967 = vmatmul.mubr.bf16.vlgmr.msra.gmra.mrb[8].mxu0 %v552_v12 }
 0x1dd   : > { %v545_v19 = vpack.c.bf16 %v532_v17, %v529_v16 }
 0x1de   : > { %v550_v20 = vmul.bf16 1009007652, %v546_v18 }
 0x1df   : > { %v549_v21 = vmul.bf16 1009007652, %v545_v19 }
 0x1e0   : > { %v554_v23 = vmax.bf16 %v550_v20, %v546_v18 }
 0x1e1   : > { %v553_v22 = vmax.bf16 %v549_v21, %v545_v19 }
 0x1e3   : > { %970 = vmatprep.mubr.bf16.mxu0 %v553_v22 }
 0x1e4   : > { %971 = vmatmul.mubr.bf16.gmra.mrb[12].mxu0 %v554_v23 }
 0x2af   : > { %v968_v24 = vpop.f32.mrb[8].mxu0 }
 0x2b0   : > { %v660_v26 = vpop.f32.mrb[9].mxu0  ;;  %v669_v28 = vadd.f32 %v968_v24, %v830_v25 }
 0x2b1   : > { %v969_v27 = vpop.f32.mrb[10].mxu0  ;;  %v661_v31 = vadd.f32 %v830_v25, %v660_v26 }
 0x2b2   : > { %v672_v29 = vadd.f32 %v969_v27, %v830_v25  ;;  %v663_v30 = vpop.f32.mrb[11].mxu0 }
 0x2b3   : > { %v664_v32 = vadd.f32 %v830_v25, %v663_v30 }
 0x2b4   : > { %v869_v33 = vpack.c.bf16 %v672_v29, %v669_v28 }
 0x2b5   : > { %v864_v34 = vpack.c.bf16 %v664_v32, %v661_v31 }
 0x2b6   : > { %881 = vst [vmem:[%s272_s20 + $0x8] sm:$0xff] %v869_v33  }
 0x2b7   : > { %865 = vst [vmem:[%s272_s20] sm:$0xff] %v864_v34   ;;  %v972_v35 = vpop.f32.mrb[12].mxu0 }
 0x2b8   : > { %v676_v36 = vpop.f32.mrb[13].mxu0  ;;  %v685_v38 = vadd.f32 %v972_v35, %v830_v25 }
 0x2b9   : > { %v973_v37 = vpop.f32.mrb[14].mxu0  ;;  %v677_v41 = vadd.f32 %v830_v25, %v676_v36 }
 0x2ba   : > { %v688_v39 = vadd.f32 %v973_v37, %v830_v25  ;;  %v679_v40 = vpop.f32.mrb[15].mxu0 }
 0x2bb   : > { %v680_v42 = vadd.f32 %v830_v25, %v679_v40 }
 0x2bc   : > { %v879_v43 = vpack.c.bf16 %v688_v39, %v685_v38 }
 0x2bd   : > { %v874_v44 = vpack.c.bf16 %v680_v42, %v677_v41 }
 0x2be   : > { %883 = vst [vmem:[%s272_s20 + $0x18] sm:$0xff] %v879_v43  }
 0x2bf   : > { %882 = vst [vmem:[%s272_s20 + $0x10] sm:$0xff] %v874_v44  }
 0x2c0   : > { %1046 = shalt.err (!%p1043_p3)
}
 0x2c1   : > { %s1047_s16 = scalar_lea.hbm %s1268_s8, 512  ;;  %s1051_s19 = scalar_lea.hbm %s1320_s7, 2048 }
 0x2c2   : > { %p1048_p4 = scmp.ne.s32.totalorder %s1268_s8, %s1047_s16  ;;  %p1052_p9 = scmp.lt.u32.totalorder %s1268_s8, %s1320_s7 }
 0x2c3   : > { %p1053_p10 = scmp.lt.u32.totalorder %s1051_s19, %s1047_s16  ;;  %p1055_p12 = scmp.lt.u32.totalorder %s1047_s16, %s1268_s8 }
 0x2c4   : > { %p1049_p7 = pnand %p1048_p4, %p1178_p5 }
 0x2c5   : > { %p1054_p11 = por %p1053_p10, %p1052_p9 }
 0x2c6   : > { %p1050_p8 = pneg %p1049_p7 }
 0x2c7   : > { %p1056_p13 = por %p1055_p12, %p1054_p11 }
 0x2c9   : > { %p1057_p0 = pnand %p1056_p13, %p1050_p8 }
 0x2cb   : > { %1060 = shalt.err (!%p1057_p0)
}
 0x2cc   : > { %s1098_s23 = smov 64   ;;  %s1099_s29 = smov 4  }
 0x2cd   : > { %974 = dma.vmem_to_hbm [thread:$0]  (%p1178_p5), %s1263_s21, 512, %s1268_s8, %s1272_s28, %s1098_s23, %s1098_s23, %s1099_s29  }
 0x2ce PF: > { %p980_p1 = scmp.ge.s32.totalorder %s1095_s27, 2  ;;  %s760_s9 = sand.u32 1, %s1083_s24  }
 0x2cf   : > { %s761_s13 = scalar_lea.sflag [#allocation3], %s760_s9 }
 0x2d0   : > { %p977_p2 = pnand %p980_p1, %p1182_p6 }
 0x2d2   : > { %1078 = dma.done.wait (!%p977_p2), %s761_s13, 512  }
 0x2d3   : > { %1080 = vsyncadd (!%p977_p2), %s761_s13, 4294966784  ;;  %p17_p3 = scmp.ge.s32.totalorder %s1165_s30, 6   ;;  %s1323_s24 = smov %s1087_s25 }
 0x2d4   : > { %s1324_s25 = smov %s1091_s26  ;;  %s1325_s26 = smov %s1176_s10 }
 0x2d5   : > { %s1326_s27 = smov %s1165_s30  ;;  %19 = sbr.rel (!%p17_p3) target bundleno = 3 (0x3), region = 83 }
 0x2dc   :  { %766 = vsyncpa [#allocation3], 1 }
 0x2dd   :  { %768 = vsyncpa [#allocation3 + $0x1], 1 }

</bundles_post_ra>
